<compile_context>
chip_gen: v7x
topology: tpu7x:2x2x1
jax: 0.10.0
libtpu: 0.0.40
codegen_flags: <defaults>
</compile_context>

<pallas_src>
import functools
import math

import jax
import jax.numpy as jnp
from jax.experimental import pallas as pl
from jax.experimental.pallas import tpu as pltpu

# ----------------------------- config ---------------------------------------
BANDS = 10
CLASSES = 9
GROUPS = 4
GROUPS_WIDTH = 16
FC_PLANES = 128
INTER = 32                                           # Res2 inter_channels
NEW_BANDS = math.ceil(BANDS / GROUPS) * GROUPS       # 12
PAD_SIZE = NEW_BANDS - BANDS                         # 2
NB_PAD = 16                                          # bands padded for alignment
C = GROUPS * GROUPS_WIDTH                            # 64
BN_EPS = 1e-5
N_LAYERS = 6                                         # conv1, 2x(res s1,s2), conv2
W_PAD = 128                                          # uniform padded layer width
MAX_TILE = 4096                                      # pixel rows per grid step
VMEM_LIMIT_BYTES = 40 * 1024 * 1024                  # fits v5e/v6e/v7x comfortably


# --------------------------- parameter setup --------------------------------
def _grouped_conv_params(key, cin, cout, groups):
    """1x1 (grouped) conv as a dense (cin, cout) block-diagonal matrix + bias."""
    cin_g = cin // groups
    cout_g = cout // groups
    bound = 1.0 / math.sqrt(cin_g)
    kw, kb = jax.random.split(key)
    blocks = jax.random.uniform(kw, (groups, cin_g, cout_g), jnp.float32,
                                -bound, bound)
    w = jax.scipy.linalg.block_diag(*[blocks[g] for g in range(groups)])
    b = jax.random.uniform(kb, (cout,), jnp.float32, -bound, bound)
    return w.astype(jnp.float32), b


def _fold_bn(w, b, cout):
    """Fold eval-mode BatchNorm (default init stats) into conv weight/bias."""
    gamma = jnp.ones((cout,), jnp.float32)
    beta = jnp.zeros((cout,), jnp.float32)
    mean = jnp.zeros((cout,), jnp.float32)
    var = jnp.ones((cout,), jnp.float32)
    s = gamma / jnp.sqrt(var + BN_EPS)
    return w * s[None, :], ((b - mean) * s + beta).reshape(1, cout)


def make_params(seed=0):
    """Build the fused / packed parameter slabs.

    Returns:
      w_slab: (6, 128, 128) bf16  -- zero-padded layer weights
      b_slab: (6, 128)      f32   -- zero-padded layer biases
      fc_w:   (128, CLASSES) f32
      fc_b:   (1, CLASSES)   f32
    """
    key = jax.random.PRNGKey(seed)
    keys = iter(jax.random.split(key, 32))

    layers = []                                      # (w (cin,cout), b (1,cout))

    # conv1 + bn1  (grouped NEW_BANDS -> C)
    w, b = _grouped_conv_params(next(keys), NEW_BANDS, C, GROUPS)
    layers.append(_fold_bn(w, b, C))

    # res0, res1 -- fuse the two branches of each Res block
    for _ in range(2):
        a1w, a1b = _fold_bn(*_grouped_conv_params(next(keys), C, C, GROUPS), C)
        a2w, a2b = _fold_bn(*_grouped_conv_params(next(keys), C, C, GROUPS), C)
        b1w, b1b = _fold_bn(*_grouped_conv_params(next(keys), C, INTER, 1), INTER)
        b2w, b2b = _fold_bn(*_grouped_conv_params(next(keys), INTER, C, 1), C)
        # stage 1: [y1 | z1] = relu(h @ [a1w | b1w] + [a1b | b1b])
        w1f = jnp.concatenate([a1w, b1w], axis=1)    # (C, C+INTER) = (64, 96)
        b1f = jnp.concatenate([a1b, b1b], axis=1)    # (1, 96)
        # stage 2: y + z = [y1 | z1] @ [[a2w];[b2w]] + (a2b + b2b)
        w2f = jnp.concatenate([a2w, b2w], axis=0)    # (96, 64)
        b2f = a2b + b2b                              # (1, 64)
        layers.append((w1f, b1f))
        layers.append((w2f, b2f))

    # conv2 + bn2 (dense C -> 128)
    w, b = _grouped_conv_params(next(keys), C, FC_PLANES, 1)
    layers.append(_fold_bn(w, b, FC_PLANES))

    # pack into padded slabs (zeros elsewhere keep padded channels exactly 0)
    w_slab = jnp.zeros((N_LAYERS, W_PAD, W_PAD), jnp.float32)
    b_slab = jnp.zeros((N_LAYERS, W_PAD), jnp.float32)
    for l, (wl, bl) in enumerate(layers):
        w_slab = w_slab.at[l, :wl.shape[0], :wl.shape[1]].set(wl)
        b_slab = b_slab.at[l, :bl.shape[1]].set(bl[0])
    w_slab = w_slab.astype(jnp.bfloat16)

    # out_fc (128 -> classes)
    bound = 1.0 / math.sqrt(FC_PLANES)
    kw, kb = jax.random.split(next(keys))
    fc_w = jax.random.uniform(kw, (FC_PLANES, CLASSES), jnp.float32,
                              -bound, bound)
    fc_b = jax.random.uniform(kb, (1, CLASSES), jnp.float32, -bound, bound)
    return w_slab, b_slab, fc_w, fc_b


# ------------------------------ kernel ---------------------------------------
def sprn_pixel_kernel(x_ref, w_ref, b_ref, o_ref, *, tile, hw):
    """Per-pixel channel pipeline + per-tile partial spatial sum.

    Grid: (B, tiles_per_image), both axes "parallel" -- every grid step writes
    its own (1, 1, 8, 128) partial-sum block (row 0 carries the sum); the
    wrapper finishes the mean.  Weight refs are sliced to their true K/N; the
    padded slab entries are exact zeros so results are unchanged.
    """
    j = pl.program_id(1)

    def mm(hb, l, k, n):
        # bf16 MXU matmul (f32 accumulate) against the true KxN slice of layer l.
        return (jnp.dot(hb, w_ref[l, :k, :n], preferred_element_type=jnp.float32)
                + b_ref[l, :n])

    def relu_bf16(a):
        # Keep inter-layer activations in bf16 (halves VMEM traffic).
        return jnp.maximum(a, 0.0).astype(jnp.bfloat16)

    x = x_ref[0]                                     # (tile, 16) bf16

    # conv1 + bn1 + relu  (grouped 12->64, input padded to 16 channels)
    h = relu_bf16(mm(x, 0, NB_PAD, C))               # (tile, 64)

    # res0, res1: branch-fused -> two matmuls each (64->96, 96->64) + residual
    for base in (1, 3):
        u = relu_bf16(mm(h, base, C, C + INTER))             # (tile, 96)
        h = relu_bf16(h + mm(u, base + 1, C + INTER, C))     # (tile, 64)

    # conv2 + bn2 + relu -> (tile, 128) features, kept f32 for pooling
    feat = jnp.maximum(mm(h, 5, C, FC_PLANES), 0.0)

    def write_partial(f):
        psum = jnp.sum(f, axis=0, keepdims=True)              # (1, 128) f32
        row0 = jax.lax.broadcasted_iota(jnp.int32, (8, 1), 0) == 0
        o_ref[...] = jnp.where(row0, psum, 0.0).reshape(1, 1, 8, FC_PLANES)

    rem = hw % tile                                  # static (trace-time) value
    if rem == 0:
        # No padded pixel rows anywhere: no mask work at all.
        write_partial(feat)
    else:
        # Only the last tile of each image has padded rows: mask only there.
        is_last = j == pl.num_programs(1) - 1

        @pl.when(is_last)
        def _():
            rows = jax.lax.broadcasted_iota(jnp.int32, (tile, 1), 0)
            write_partial(jnp.where(rows < rem, feat, 0.0))

        @pl.when(jnp.logical_not(is_last))
        def _():
            write_partial(feat)


# ------------------------------ wrapper --------------------------------------
def sprn_forward(x5, w_slab, b_slab, fc_w, fc_b):
    # x5: (B, 1, bands, H, W) float32
    B = x5.shape[0]
    H, W = x5.shape[3], x5.shape[4]
    HW = H * W

    # ReplicationPad3d((0,0,0,0,0,pad_size)) on the bands axis, then squeeze(1)
    if PAD_SIZE > 0:
        rep = jnp.repeat(x5[:, :, -1:, :, :], PAD_SIZE, axis=2)
        x5 = jnp.concatenate([x5, rep], axis=2)
    x = jnp.squeeze(x5, axis=1)                      # (B, NEW_BANDS, H, W) NCHW

    # NCHW -> per-image pixel-major channels-last (B, H*W, NEW_BANDS)
    x_pix = jnp.transpose(x, (0, 2, 3, 1)).reshape(B, HW, NEW_BANDS)

    # Tile selection: big tiles so the MXU (not per-grid-step overhead) binds;
    # small images use one tile rounded to a multiple of 8 (sublane rule) so
    # almost no padded rows are processed.
    if HW >= MAX_TILE:
        tile = MAX_TILE
    else:
        tile = max(8, -(-HW // 8) * 8)
    tiles_per_img = -(-HW // tile)
    hw_pad = tiles_per_img * tile

    # Pad pixels (masked in-kernel) and channels (zero weight rows), cast bf16.
    x_pix = jnp.pad(x_pix, ((0, 0), (0, hw_pad - HW), (0, NB_PAD - NEW_BANDS)))
    x_pix = x_pix.astype(jnp.bfloat16)

    kernel = functools.partial(sprn_pixel_kernel, tile=tile, hw=HW)

    # Per-(image, tile) partial sums; both grid axes parallel (v7x dual-core).
    partials = pl.pallas_call(
        kernel,
        out_shape=jax.ShapeDtypeStruct((B, tiles_per_img, 8, FC_PLANES),
                                       jnp.float32),
        grid=(B, tiles_per_img),
        in_specs=[
            pl.BlockSpec((1, tile, NB_PAD), lambda b, j: (b, j, 0)),
            pl.BlockSpec((N_LAYERS, W_PAD, W_PAD), lambda b, j: (0, 0, 0)),
            pl.BlockSpec((N_LAYERS, W_PAD), lambda b, j: (0, 0)),
        ],
        out_specs=pl.BlockSpec((1, 1, 8, FC_PLANES), lambda b, j: (b, j, 0, 0)),
        compiler_params=pltpu.CompilerParams(
            dimension_semantics=("parallel", "parallel"),
            vmem_limit_bytes=VMEM_LIMIT_BYTES),
    )(x_pix, w_slab, b_slab)

    # Finish the adaptive avg pool: reduce the tiny partial tensor in XLA.
    pooled = jnp.sum(partials, axis=(1, 2)) * jnp.float32(1.0 / HW)   # (B, 128)

    # Final (B,128)x(128,9) linear: far too small for a custom kernel.
    return jnp.dot(pooled, fc_w) + fc_b


# --------------------------- pure-JAX reference -------------------------------
def sprn_reference(x5, w_slab, b_slab, fc_w, fc_b):
    """f32 reference using the same packed weights (validates the kernel)."""
    B = x5.shape[0]
    H, W = x5.shape[3], x5.shape[4]
    HW = H * W
    if PAD_SIZE > 0:
        rep = jnp.repeat(x5[:, :, -1:, :, :], PAD_SIZE, axis=2)
        x5 = jnp.concatenate([x5, rep], axis=2)
    x = jnp.transpose(jnp.squeeze(x5, 1), (0, 2, 3, 1)).reshape(B, HW, NEW_BANDS)
    w = w_slab.astype(jnp.float32)
    h = jax.nn.relu(x @ w[0, :NEW_BANDS, :C] + b_slab[0, :C])
    for base in (1, 3):
        u = jax.nn.relu(h @ w[base, :C, :C + INTER] + b_slab[base, :C + INTER])
        h = jax.nn.relu(h + u @ w[base + 1, :C + INTER, :C] + b_slab[base + 1, :C])
    feat = jax.nn.relu(h @ w[5, :C, :] + b_slab[5, :])
    pooled = jnp.mean(feat, axis=1)
    return pooled @ fc_w + fc_b


# ------------------------------- main ----------------------------------------
if __name__ == "__main__":
    key = jax.random.PRNGKey(0)
    B, Hs, Ws = 2, 8, 8
    x = jax.random.normal(key, (B, 1, BANDS, Hs, Ws), dtype=jnp.float32)

    params = make_params(seed=0)

    fwd = jax.jit(sprn_forward)
    out = jax.block_until_ready(fwd(x, *params))
    assert out.shape == (B, CLASSES), out.shape

    ref = sprn_reference(x, *params)
    # bf16 matmuls (f32 accumulate) vs f32 reference: loose tolerance.
    assert jnp.allclose(out, ref, atol=5e-2, rtol=5e-2), (out, ref)

    print("KERNEL_OK")
</pallas_src>

<mosaic_0001>
module attributes {stable_mosaic.version = 11 : i64} {
  func.func @sprn_pixel_kernel(%arg0: i32, %arg1: i32, %arg2: memref<1x64x16xbf16, #tpu.memory_space<vmem>>, %arg3: memref<6x128x128xbf16, #tpu.memory_space<vmem>>, %arg4: memref<6x128xf32, #tpu.memory_space<vmem>>, %arg5: memref<1x1x8x128xf32, #tpu.memory_space<vmem>>) attributes {dimension_semantics = [#tpu.dimension_semantics<parallel>, #tpu.dimension_semantics<parallel>], iteration_bounds = array<i64: 2, 1>, scalar_prefetch = 0 : i64, scratch_operands = 0 : i64, tpu.core_type = #tpu.core_type<tc>, window_params = [{transform_indices = @transform_0, window_bounds = array<i64: 1, 64, 16>}, {pipeline_mode = #tpu.pipeline_mode<synchronous>, transform_indices = @transform_1, window_bounds = array<i64: 6, 128, 128>}, {pipeline_mode = #tpu.pipeline_mode<synchronous>, transform_indices = @transform_2, window_bounds = array<i64: 6, 128>}, {transform_indices = @transform_3, window_bounds = array<i64: 1, 1, 8, 128>}]} {
    %c0 = arith.constant 0 : index
    %c0_0 = arith.constant 0 : index
    %c0_1 = arith.constant 0 : index
    %0 = vector.load %arg2[%c0, %c0_0, %c0_1] : memref<1x64x16xbf16, #tpu.memory_space<vmem>>, vector<1x64x16xbf16>
    %1 = vector.shape_cast %0 : vector<1x64x16xbf16> to vector<64x16xbf16>
    %c0_2 = arith.constant 0 : index
    %c0_3 = arith.constant 0 : index
    %c0_4 = arith.constant 0 : index
    %2 = vector.load %arg3[%c0_2, %c0_3, %c0_4] : memref<6x128x128xbf16, #tpu.memory_space<vmem>>, vector<1x16x64xbf16>
    %3 = vector.shape_cast %2 : vector<1x16x64xbf16> to vector<16x64xbf16>
    %cst = arith.constant dense<0.000000e+00> : vector<64x64xf32>
    %4 = tpu.matmul %1, %3, %cst {dimension_numbers = #tpu.dot_dimension_numbers<[1], [0], [0], [1], [0, 0, 1, 1], [], []>} : vector<64x16xbf16>, vector<16x64xbf16>, vector<64x64xf32> -> vector<64x64xf32>
    %c0_5 = arith.constant 0 : index
    %c0_6 = arith.constant 0 : index
    %5 = vector.load %arg4[%c0_5, %c0_6] : memref<6x128xf32, #tpu.memory_space<vmem>>, vector<1x64xf32>
    %6 = vector.shape_cast %5 : vector<1x64xf32> to vector<64xf32>
    %7 = vector.shape_cast %6 : vector<64xf32> to vector<1x64xf32>
    %8 = vector.broadcast %7 : vector<1x64xf32> to vector<64x64xf32>
    %9 = arith.addf %4, %8 : vector<64x64xf32>
    %cst_7 = arith.constant 0.000000e+00 : f32
    %10 = vector.broadcast %cst_7 : f32 to vector<64x64xf32>
    %11 = arith.maximumf %9, %10 : vector<64x64xf32>
    %12 = arith.truncf %11 : vector<64x64xf32> to vector<64x64xbf16>
    %c1 = arith.constant 1 : index
    %c0_8 = arith.constant 0 : index
    %c0_9 = arith.constant 0 : index
    %13 = vector.load %arg3[%c1, %c0_8, %c0_9] : memref<6x128x128xbf16, #tpu.memory_space<vmem>>, vector<1x64x96xbf16>
    %14 = vector.shape_cast %13 : vector<1x64x96xbf16> to vector<64x96xbf16>
    %cst_10 = arith.constant dense<0.000000e+00> : vector<64x96xf32>
    %15 = tpu.matmul %12, %14, %cst_10 {dimension_numbers = #tpu.dot_dimension_numbers<[1], [0], [0], [1], [0, 0, 1, 1], [], []>} : vector<64x64xbf16>, vector<64x96xbf16>, vector<64x96xf32> -> vector<64x96xf32>
    %c1_11 = arith.constant 1 : index
    %c0_12 = arith.constant 0 : index
    %16 = vector.load %arg4[%c1_11, %c0_12] : memref<6x128xf32, #tpu.memory_space<vmem>>, vector<1x96xf32>
    %17 = vector.shape_cast %16 : vector<1x96xf32> to vector<96xf32>
    %18 = vector.shape_cast %17 : vector<96xf32> to vector<1x96xf32>
    %19 = vector.broadcast %18 : vector<1x96xf32> to vector<64x96xf32>
    %20 = arith.addf %15, %19 : vector<64x96xf32>
    %cst_13 = arith.constant 0.000000e+00 : f32
    %21 = vector.broadcast %cst_13 : f32 to vector<64x96xf32>
    %22 = arith.maximumf %20, %21 : vector<64x96xf32>
    %23 = arith.truncf %22 : vector<64x96xf32> to vector<64x96xbf16>
    %c2 = arith.constant 2 : index
    %c0_14 = arith.constant 0 : index
    %c0_15 = arith.constant 0 : index
    %24 = vector.load %arg3[%c2, %c0_14, %c0_15] : memref<6x128x128xbf16, #tpu.memory_space<vmem>>, vector<1x96x64xbf16>
    %25 = vector.shape_cast %24 : vector<1x96x64xbf16> to vector<96x64xbf16>
    %cst_16 = arith.constant dense<0.000000e+00> : vector<64x64xf32>
    %26 = tpu.matmul %23, %25, %cst_16 {dimension_numbers = #tpu.dot_dimension_numbers<[1], [0], [0], [1], [0, 0, 1, 1], [], []>} : vector<64x96xbf16>, vector<96x64xbf16>, vector<64x64xf32> -> vector<64x64xf32>
    %c2_17 = arith.constant 2 : index
    %c0_18 = arith.constant 0 : index
    %27 = vector.load %arg4[%c2_17, %c0_18] : memref<6x128xf32, #tpu.memory_space<vmem>>, vector<1x64xf32>
    %28 = vector.shape_cast %27 : vector<1x64xf32> to vector<64xf32>
    %29 = vector.shape_cast %28 : vector<64xf32> to vector<1x64xf32>
    %30 = vector.broadcast %29 : vector<1x64xf32> to vector<64x64xf32>
    %31 = arith.addf %26, %30 : vector<64x64xf32>
    %32 = arith.extf %12 : vector<64x64xbf16> to vector<64x64xf32>
    %33 = arith.addf %32, %31 : vector<64x64xf32>
    %cst_19 = arith.constant 0.000000e+00 : f32
    %34 = vector.broadcast %cst_19 : f32 to vector<64x64xf32>
    %35 = arith.maximumf %33, %34 : vector<64x64xf32>
    %36 = arith.truncf %35 : vector<64x64xf32> to vector<64x64xbf16>
    %c3 = arith.constant 3 : index
    %c0_20 = arith.constant 0 : index
    %c0_21 = arith.constant 0 : index
    %37 = vector.load %arg3[%c3, %c0_20, %c0_21] : memref<6x128x128xbf16, #tpu.memory_space<vmem>>, vector<1x64x96xbf16>
    %38 = vector.shape_cast %37 : vector<1x64x96xbf16> to vector<64x96xbf16>
    %cst_22 = arith.constant dense<0.000000e+00> : vector<64x96xf32>
    %39 = tpu.matmul %36, %38, %cst_22 {dimension_numbers = #tpu.dot_dimension_numbers<[1], [0], [0], [1], [0, 0, 1, 1], [], []>} : vector<64x64xbf16>, vector<64x96xbf16>, vector<64x96xf32> -> vector<64x96xf32>
    %c3_23 = arith.constant 3 : index
    %c0_24 = arith.constant 0 : index
    %40 = vector.load %arg4[%c3_23, %c0_24] : memref<6x128xf32, #tpu.memory_space<vmem>>, vector<1x96xf32>
    %41 = vector.shape_cast %40 : vector<1x96xf32> to vector<96xf32>
    %42 = vector.shape_cast %41 : vector<96xf32> to vector<1x96xf32>
    %43 = vector.broadcast %42 : vector<1x96xf32> to vector<64x96xf32>
    %44 = arith.addf %39, %43 : vector<64x96xf32>
    %cst_25 = arith.constant 0.000000e+00 : f32
    %45 = vector.broadcast %cst_25 : f32 to vector<64x96xf32>
    %46 = arith.maximumf %44, %45 : vector<64x96xf32>
    %47 = arith.truncf %46 : vector<64x96xf32> to vector<64x96xbf16>
    %c4 = arith.constant 4 : index
    %c0_26 = arith.constant 0 : index
    %c0_27 = arith.constant 0 : index
    %48 = vector.load %arg3[%c4, %c0_26, %c0_27] : memref<6x128x128xbf16, #tpu.memory_space<vmem>>, vector<1x96x64xbf16>
    %49 = vector.shape_cast %48 : vector<1x96x64xbf16> to vector<96x64xbf16>
    %cst_28 = arith.constant dense<0.000000e+00> : vector<64x64xf32>
    %50 = tpu.matmul %47, %49, %cst_28 {dimension_numbers = #tpu.dot_dimension_numbers<[1], [0], [0], [1], [0, 0, 1, 1], [], []>} : vector<64x96xbf16>, vector<96x64xbf16>, vector<64x64xf32> -> vector<64x64xf32>
    %c4_29 = arith.constant 4 : index
    %c0_30 = arith.constant 0 : index
    %51 = vector.load %arg4[%c4_29, %c0_30] : memref<6x128xf32, #tpu.memory_space<vmem>>, vector<1x64xf32>
    %52 = vector.shape_cast %51 : vector<1x64xf32> to vector<64xf32>
    %53 = vector.shape_cast %52 : vector<64xf32> to vector<1x64xf32>
    %54 = vector.broadcast %53 : vector<1x64xf32> to vector<64x64xf32>
    %55 = arith.addf %50, %54 : vector<64x64xf32>
    %56 = arith.extf %36 : vector<64x64xbf16> to vector<64x64xf32>
    %57 = arith.addf %56, %55 : vector<64x64xf32>
    %cst_31 = arith.constant 0.000000e+00 : f32
    %58 = vector.broadcast %cst_31 : f32 to vector<64x64xf32>
    %59 = arith.maximumf %57, %58 : vector<64x64xf32>
    %60 = arith.truncf %59 : vector<64x64xf32> to vector<64x64xbf16>
    %c5 = arith.constant 5 : index
    %c0_32 = arith.constant 0 : index
    %c0_33 = arith.constant 0 : index
    %61 = vector.load %arg3[%c5, %c0_32, %c0_33] : memref<6x128x128xbf16, #tpu.memory_space<vmem>>, vector<1x64x128xbf16>
    %62 = vector.shape_cast %61 : vector<1x64x128xbf16> to vector<64x128xbf16>
    %cst_34 = arith.constant dense<0.000000e+00> : vector<64x128xf32>
    %63 = tpu.matmul %60, %62, %cst_34 {dimension_numbers = #tpu.dot_dimension_numbers<[1], [0], [0], [1], [0, 0, 1, 1], [], []>} : vector<64x64xbf16>, vector<64x128xbf16>, vector<64x128xf32> -> vector<64x128xf32>
    %c5_35 = arith.constant 5 : index
    %c0_36 = arith.constant 0 : index
    %64 = vector.load %arg4[%c5_35, %c0_36] : memref<6x128xf32, #tpu.memory_space<vmem>>, vector<1x128xf32>
    %65 = vector.shape_cast %64 : vector<1x128xf32> to vector<128xf32>
    %66 = vector.shape_cast %65 : vector<128xf32> to vector<1x128xf32>
    %67 = vector.broadcast %66 : vector<1x128xf32> to vector<64x128xf32>
    %68 = arith.addf %63, %67 : vector<64x128xf32>
    %cst_37 = arith.constant 0.000000e+00 : f32
    %69 = vector.broadcast %cst_37 : f32 to vector<64x128xf32>
    %70 = arith.maximumf %68, %69 : vector<64x128xf32>
    %cst_38 = arith.constant dense<0.000000e+00> : vector<128xf32>
    %71 = vector.multi_reduction <add>, %70, %cst_38 [0] : vector<64x128xf32> to vector<128xf32>
    %72 = vector.shape_cast %71 : vector<128xf32> to vector<1x128xf32>
    %73 = tpu.iota {dimensions = array<i32: 0>} : vector<8x1xi32>
    %c0_i32 = arith.constant 0 : i32
    %74 = vector.broadcast %c0_i32 : i32 to vector<8x1xi32>
    %75 = arith.cmpi eq, %73, %74 : vector<8x1xi32>
    %cst_39 = arith.constant 0.000000e+00 : f32
    %76 = vector.shape_cast %75 : vector<8x1xi1> to vector<8x1xi1>
    %77 = vector.broadcast %76 : vector<8x1xi1> to vector<8x128xi1>
    %78 = vector.shape_cast %72 : vector<1x128xf32> to vector<1x128xf32>
    %79 = vector.broadcast %78 : vector<1x128xf32> to vector<8x128xf32>
    %80 = vector.broadcast %cst_39 : f32 to vector<8x128xf32>
    %81 = arith.select %77, %79, %80 : vector<8x128xi1>, vector<8x128xf32>
    %82 = vector.shape_cast %81 : vector<8x128xf32> to vector<1x1x8x128xf32>
    %c0_40 = arith.constant 0 : index
    %c0_41 = arith.constant 0 : index
    %c0_42 = arith.constant 0 : index
    %c0_43 = arith.constant 0 : index
    %83 = vector.load %arg5[%c0_40, %c0_41, %c0_42, %c0_43] : memref<1x1x8x128xf32, #tpu.memory_space<vmem>>, vector<1x1x8x128xf32>
    tpu.vector_store %arg5[%c0_40, %c0_41, %c0_42, %c0_43], %82 {strides = array<i32>} : memref<1x1x8x128xf32, #tpu.memory_space<vmem>>, vector<1x1x8x128xf32>,
    return
  }
  func.func @transform_0(%arg0: i32, %arg1: i32) -> (i32, i32, i32) {
    %c0_i32 = arith.constant 0 : i32
    %c0_i32_0 = arith.constant 0 : i32
    return %arg0, %arg1, %c0_i32 : i32, i32, i32
  }
  func.func @transform_1(%arg0: i32, %arg1: i32) -> (i32, i32, i32) {
    %c0_i32 = arith.constant 0 : i32
    %c0_i32_0 = arith.constant 0 : i32
    %c0_i32_1 = arith.constant 0 : i32
    %c0_i32_2 = arith.constant 0 : i32
    return %c0_i32, %c0_i32_0, %c0_i32_1 : i32, i32, i32
  }
  func.func @transform_2(%arg0: i32, %arg1: i32) -> (i32, i32) {
    %c0_i32 = arith.constant 0 : i32
    %c0_i32_0 = arith.constant 0 : i32
    %c0_i32_1 = arith.constant 0 : i32
    return %c0_i32, %c0_i32_0 : i32, i32
  }
  func.func @transform_3(%arg0: i32, %arg1: i32) -> (i32, i32, i32, i32) {
    %c0_i32 = arith.constant 0 : i32
    %c0_i32_0 = arith.constant 0 : i32
    %c0_i32_1 = arith.constant 0 : i32
    return %arg0, %arg1, %c0_i32, %c0_i32_0 : i32, i32, i32, i32
  }
}

</mosaic_0001>

<bundles_post_ra>
// kernel: sprn_forward.1
= control target key start
LH: loop header
LB: loop body
LE: loop exit
PB: predicated region body
PF: predicated region fallthrough
CT: control target
= control target key end

     0   :  { %s1493_s12 = smov 0   ;;  %s1495_s13 = smov 0   ;;  %s1683_s0 = inlined_call_operand.vmem [shape: bf16[2,64,16], index: 0, kind: input, shape index: {}]   ;;  %s1684_s1 = inlined_call_operand.vmem [shape: bf16[6,128,128], index: 1, kind: input, shape index: {}]   ;;  %s1685_s2 = inlined_call_operand.vmem [shape: f32[6,128], index: 2, kind: input, shape index: {}]   ;;  %s1686_s3 = inlined_call_operand.vmem [shape: f32[2,1,8,128], index: 3, kind: output, shape index: {}]  }
   0x1   :  { %s1497_s14 = smov 0  }
   0x2 LB: > { %s25_s15 = sadd.s32 1, %s1467_s13  ;;  %p1135_p0 = scmp.ge.s32.totalorder %s1471_s14, 1  ;;  %s1471_s14 = sphi %s1497_s14, %s13_s14   ;;  %s1467_s13 = sphi %s1495_s13, %s1688_s13   ;;  %s1463_s12 = sphi %s1493_s12, %s1687_s12  }
   0x3   : > { %p27_p1 = scmp.ge.s32.totalorder %s25_s15, 2  ;;  %p158_p2 = scmp.lt.s32.totalorder %s1471_s14, 3 }
   0x5   : > { %s1690_s15 = smov (%p27_p1, %s25_s15), 0  ;;  %p159_p3 = pnand %p1135_p0, %p158_p2 }
   0x6   : > { %v1420_v0 = vld [vmem:[%s1684_s1] sm:$0xff] (!%p159_p3)   ;;  %p189_p4 = scmp.lt.s32.totalorder (!%p159_p3), %s1463_s12, 1  ;;  %v1426_v2 = vld [vmem:[%s1684_s1 + $0x48] sm:$0xff] (!%p159_p3)   ;;  %vm247_vm0 = vcmask (!%p159_p3), 130048   ;;  %v1427_v7 = vld [vmem:[%s1684_s1 + $0x50] sm:$0xff] (!%p159_p3)   ;;  %vm375_vm1 = vcmask (!%p159_p3), 523264  }
   0x7   : > { %162 = sbr.rel (%p159_p3) target bundleno = 1380 (0x564), region = 32  ;;  %v1425_v1 = vld [vmem:[%s1684_s1 + $0x40] sm:$0xff] (!%p159_p3)   ;;  %1298 = vmatprep.subr.bf16.mxu0 (!%p159_p3), %v1420_v0  ;;  %v1428_v8 = vld [vmem:[%s1684_s1 + $0x58] sm:$0xff] (!%p159_p3)   ;;  %v1430_v10 = vld [vmem:[%s1684_s1 + $0x88] sm:$0xff] (!%p159_p3)   ;;  %vm519_vm2 = vcmask (!%p159_p3), 785408  }
   0x8   : > { %1299 = vmatpush3.bf16.msra.mxu0 (!%p159_p3), %v1420_v0  ;;  %1308 = vmatprep.subr.bf16.mxu1 (!%p159_p3), %v1425_v1  ;;  %v1429_v9 = vld [vmem:[%s1684_s1 + $0x80] sm:$0xff] (!%p159_p3)   ;;  %v1431_v11 = vld [vmem:[%s1684_s1 + $0x90] sm:$0xff] (!%p159_p3)   ;;  %v1432_v12 = vld [vmem:[%s1684_s1 + $0x98] sm:$0xff] (!%p159_p3)  }
   0x9   : > { %1309 = vmatpush3.bf16.msra.mxu1 (!%p159_p3), %v1425_v1  ;;  %1324 = vmatprep.subr.bf16.mxu0 (!%p159_p3), %v1429_v9  ;;  %v1139_v13 = vld [vmem:[%s1685_s2] ss:$0 sm:$0xff] (!%p159_p3)  ;;  %v1434_v43 = vld [vmem:[%s1684_s1 + $0xa8] sm:$0xff] (!%p159_p3)   ;;  %v1157_v45 = vld [vmem:[%s1685_s2 + $0x1] ss:$0 sm:$0xff] (!%p159_p3) }
   0xa   : > { %1310 = vmatprep.subr.bf16.mxu1 (!%p159_p3), %v1426_v2  ;;  %v1433_v42 = vld [vmem:[%s1684_s1 + $0xa0] sm:$0xff] (!%p159_p3)  }
   0xb   : > { %v1435_v44 = vld [vmem:[%s1684_s1 + $0xc0] sm:$0xff] (!%p159_p3)  }
   0xd   : > { %1311 = vmatpush3.bf16.msra.mxu1 (!%p159_p3), %v1426_v2 }
   0xe   : > { %s1692_s12 = smov (!%p189_p4, %s1463_s12), 1  ;;  %1312 = vmatprep.subr.bf16.mxu1 %v1427_v7 }
   0xf   : > { %s1248_s22 = sshll.u32 %s1692_s12, 5  ;;  %s1138_s9 = sshll.u32 %s1692_s12, 3 }
  0x10   : > { %s196_s25 = scalar_lea.vmem %s1683_s0, %s1248_s22  ;;  %s204_s16 = scalar_lea.vmem %s1686_s3, %s1138_s9 }
  0x11   : > { %v1421_v3 = vld [vmem:[%s196_s25] sm:$0xff]   ;;  %v1422_v4 = vld [vmem:[%s196_s25 + $0x8] sm:$0xff]   ;;  %v1423_v5 = vld [vmem:[%s196_s25 + $0x10] sm:$0xff]   ;;  %1313 = vmatpush3.bf16.msra.mxu1 %v1427_v7 }
  0x12   : > { %1300 = vmatprep.mubr.msk.bf16.mxu0 %vm247_vm0, %v1421_v3  ;;  %v1424_v6 = vld [vmem:[%s196_s25 + $0x18] sm:$0xff]   ;;  %1314 = vmatprep.subr.bf16.mxu1 %v1428_v8 }
  0x13   : > { %1301 = vmatmul.mubr.msk.bf16.vlgmr.msra.gmra.mrb[0].mxu0 %vm247_vm0, %v1422_v4 }
  0x14   : > { %1304 = vmatprep.mubr.msk.bf16.mxu0 %vm247_vm0, %v1423_v5  ;;  %1325 = vmatpush3.bf16.msra.mxu0 %v1429_v9 }
  0x15   : > { %1315 = vmatpush3.bf16.msra.mxu1 %v1428_v8  ;;  %1326 = vmatprep.subr.bf16.mxu0 %v1430_v10 }
  0x16   : > { %1344 = vmatprep.subr.bf16.mxu1 %v1435_v44 }
  0x18   : > { %1327 = vmatpush3.bf16.msra.mxu0 %v1430_v10  ;;  %v1436_v10 = vld [vmem:[%s1684_s1 + $0xc8] sm:$0xff]  }
  0x19   : > { %1328 = vmatprep.subr.bf16.mxu0 %v1431_v11 }
  0x1b   : > { %1305 = vmatmul.mubr.msk.bf16.gmra.mrb[4].mxu0 %vm247_vm0, %v1424_v6 }
  0x1c   : > { %1329 = vmatpush3.bf16.msra.mxu0 %v1431_v11  ;;  %v1437_v11 = vld [vmem:[%s1684_s1 + $0xd0] sm:$0xff]  }
  0x1d   : > { %1330 = vmatprep.subr.bf16.mxu0 %v1432_v12 }
  0x20   : > { %1331 = vmatpush3.bf16.msra.mxu0 %v1432_v12  ;;  %v1438_v12 = vld [vmem:[%s1684_s1 + $0xd8] sm:$0xff]  }
  0x21   : > { %1332 = vmatprep.subr.bf16.mxu0 %v1433_v42 }
  0x24   : > { %1333 = vmatpush3.bf16.msra.mxu0 %v1433_v42 }
  0x25   : > { %1334 = vmatprep.subr.bf16.mxu0 %v1434_v43 }
  0x28   : > { %1335 = vmatpush3.bf16.msra.mxu0 %v1434_v43 }
  0xe6   : > { %v1302_v14 = vpop.f32.mrb[0].mxu0 }
  0xe7   : > { %v303_v15 = vadd.f32 %v1302_v14, %v1139_v13  ;;  %v294_v16 = vpop.f32.mrb[1].mxu0  ;;  %v1440_v14 = vld [vmem:[%s1684_s1 + $0x108] sm:$0xff]  }
  0xe8   : > { %v295_v17 = vadd.f32 %v1139_v13, %v294_v16  ;;  %v1303_v18 = vpop.f32.mrb[2].mxu0  ;;  %v1442_v16 = vld [vmem:[%s1684_s1 + $0x118] sm:$0xff]  }
  0xe9   : > { %v306_v19 = vadd.f32 %v1303_v18, %v1139_v13  ;;  %v297_v20 = vpop.f32.mrb[3].mxu0  ;;  %v327_v22 = vmax.f32 %v303_v15, 0.0  ;;  %v1441_v15 = vld [vmem:[%s1684_s1 + $0x110] sm:$0xff]  }
  0xea   : > { %v298_v21 = vadd.f32 %v1139_v13, %v297_v20  ;;  %v325_v24 = vmax.f32 %v295_v17, 0.0  ;;  %v1178_v17 = vld [vmem:[%s1685_s2 + $0x2] ss:$0 sm:$0xff] }
  0xeb   : > { %v328_v23 = vmax.f32 %v306_v19, 0.0 }
  0xec   : > { %v326_v25 = vmax.f32 %v298_v21, 0.0 }
  0xed   : > { %v1547_v26 = vpack.c.bf16 %v328_v23, %v327_v22 }
  0xee   : > { %v1549_v27 = vpack.c.bf16 %v326_v25, %v325_v24  ;;  %v1306_v28 = vpop.f32.mrb[4].mxu0 }
  0xef   : > { %v319_v29 = vadd.f32 %v1306_v28, %v1139_v13  ;;  %v310_v30 = vpop.f32.mrb[5].mxu0  ;;  %v599_v20 = vunpack.c.l.bf16 %v1547_v26 }
  0xf0   : > { %v311_v31 = vadd.f32 %v1139_v13, %v310_v30  ;;  %v1307_v32 = vpop.f32.mrb[6].mxu0  ;;  %1316 = vmatprep.mubr.msk.bf16.mxu1 %vm375_vm1, %v1549_v27  ;;  %v597_v23 = vunpack.c.l.bf16 %v1549_v27 }
  0xf1   : > { %v322_v33 = vadd.f32 %v1307_v32, %v1139_v13  ;;  %v313_v34 = vpop.f32.mrb[7].mxu0  ;;  %1317 = vmatmul.mubr.msk.bf16.vlgmr.msra.gmra.mrb[0].mxu1 %vm375_vm1, %v1547_v26  ;;  %v331_v36 = vmax.f32 %v319_v29, 0.0  ;;  %v600_v29 = vunpack.c.h.bf16 %v1547_v26 }
  0xf2   : > { %v314_v35 = vadd.f32 %v1139_v13, %v313_v34  ;;  %v329_v38 = vmax.f32 %v311_v31, 0.0  ;;  %1345 = vmatpush3.bf16.msra.mxu1 %v1435_v44  ;;  %v1439_v13 = vld [vmem:[%s1684_s1 + $0x100] sm:$0xff]  }
  0xf3   : > { %v332_v37 = vmax.f32 %v322_v33, 0.0  ;;  %1346 = vmatprep.subr.bf16.mxu1 %v1436_v10  ;;  %1360 = vmatprep.subr.bf16.mxu0 %v1439_v13  ;;  %v598_v33 = vunpack.c.h.bf16 %v1549_v27 }
  0xf4   : > { %v330_v39 = vmax.f32 %v314_v35, 0.0 }
  0xf5   : > { %v1555_v40 = vpack.c.bf16 %v332_v37, %v331_v36 }
  0xf6   : > { %v1557_v41 = vpack.c.bf16 %v330_v39, %v329_v38  ;;  %1347 = vmatpush3.bf16.msra.mxu1 %v1436_v10 }
  0xf7   : > { %1348 = vmatprep.subr.bf16.mxu1 %v1437_v11 }
  0xf8   : > { %1320 = vmatprep.mubr.msk.bf16.mxu1 %vm375_vm1, %v1557_v41 }
  0xf9   : > { %1321 = vmatmul.mubr.msk.bf16.gmra.mrb[4].mxu1 %vm375_vm1, %v1555_v40 }
  0xfa   : > { %1349 = vmatpush3.bf16.msra.mxu1 %v1437_v11 }
  0xfb   : > { %1350 = vmatprep.subr.bf16.mxu1 %v1438_v12 }
  0xfe   : > { %1351 = vmatpush3.bf16.msra.mxu1 %v1438_v12 }
 0x1c4   : > { %v1318_v46 = vpop.f32.mrb[0].mxu1 }
 0x1c5   : > { %v431_v47 = vadd.f32 %v1318_v46, %v1157_v45  ;;  %v422_v48 = vpop.f32.mrb[1].mxu1 }
 0x1c6   : > { %v423_v49 = vadd.f32 %v1157_v45, %v422_v48  ;;  %v1319_v50 = vpop.f32.mrb[2].mxu1  ;;  %v601_v48 = vunpack.c.l.bf16 %v1557_v41 }
 0x1c7   : > { %v434_v51 = vadd.f32 %v1319_v50, %v1157_v45  ;;  %v425_v52 = vpop.f32.mrb[3].mxu1  ;;  %v455_v54 = vmax.f32 %v431_v47, 0.0 }
 0x1c8   : > { %v426_v53 = vadd.f32 %v1157_v45, %v425_v52  ;;  %v453_v56 = vmax.f32 %v423_v49, 0.0 }
 0x1c9   : > { %v456_v55 = vmax.f32 %v434_v51, 0.0  ;;  %v604_v51 = vunpack.c.h.bf16 %v1555_v40 }
 0x1ca   : > { %v454_v57 = vmax.f32 %v426_v53, 0.0 }
 0x1cb   : > { %v462_v58 = vpack.c.bf16 %v456_v55, %v455_v54  ;;  %v602_v55 = vunpack.c.h.bf16 %v1557_v41  ;;  %v1443_v41 = vld [vmem:[%s1684_s1 + $0x120] sm:$0xff]  }
 0x1cc   : > { %v461_v59 = vpack.c.bf16 %v454_v57, %v453_v56  ;;  %v1322_v60 = vpop.f32.mrb[4].mxu1 }
 0x1cd   : > { %v447_v61 = vadd.f32 %v1322_v60, %v1157_v45  ;;  %v438_v62 = vpop.f32.mrb[5].mxu1 }
 0x1ce   : > { %v439_v63 = vadd.f32 %v1157_v45, %v438_v62  ;;  %v1323_v0 = vpop.f32.mrb[6].mxu1  ;;  %1336 = vmatprep.mubr.msk.bf16.mxu0 %vm519_vm2, %v461_v59 }
 0x1cf   : > { %v450_v1 = vadd.f32 %v1323_v0, %v1157_v45  ;;  %v441_v2 = vpop.f32.mrb[7].mxu1  ;;  %1337 = vmatmul.mubr.msk.bf16.vlgmr.msra.gmra.mrb[8].mxu0 %vm519_vm2, %v462_v58  ;;  %v459_v4 = vmax.f32 %v447_v61, 0.0  ;;  %v1445_v0 = vld [vmem:[%s1684_s1 + $0x140] sm:$0xff]  }
 0x1d0   : > { %v442_v3 = vadd.f32 %v1157_v45, %v441_v2  ;;  %v457_v6 = vmax.f32 %v439_v63, 0.0  ;;  %1361 = vmatpush3.bf16.msra.mxu0 %v1439_v13  ;;  %v603_v45 = vunpack.c.l.bf16 %v1555_v40  ;;  %v1444_v63 = vld [vmem:[%s1684_s1 + $0x128] sm:$0xff]   ;;  %1380 = vmatprep.subr.bf16.mxu1 %v1445_v0 }
 0x1d1   : > { %v460_v5 = vmax.f32 %v450_v1, 0.0  ;;  %1362 = vmatprep.subr.bf16.mxu0 %v1440_v14  ;;  %v1197_v1 = vld [vmem:[%s1685_s2 + $0x3] ss:$0 sm:$0xff] }
 0x1d2   : > { %v458_v7 = vmax.f32 %v442_v3, 0.0 }
 0x1d3   : > { %v464_v8 = vpack.c.bf16 %v460_v5, %v459_v4 }
 0x1d4   : > { %v463_v9 = vpack.c.bf16 %v458_v7, %v457_v6  ;;  %1363 = vmatpush3.bf16.msra.mxu0 %v1440_v14 }
 0x1d5   : > { %1364 = vmatprep.subr.bf16.mxu0 %v1441_v15 }
 0x1d6   : > { %1340 = vmatprep.mubr.msk.bf16.mxu0 %vm519_vm2, %v463_v9 }
 0x1d7   : > { %1341 = vmatmul.mubr.msk.bf16.gmra.mrb[12].mxu0 %vm519_vm2, %v464_v8 }
 0x1d8   : > { %1365 = vmatpush3.bf16.msra.mxu0 %v1441_v15 }
 0x1d9   : > { %1366 = vmatprep.subr.bf16.mxu0 %v1442_v16 }
 0x1dc   : > { %1367 = vmatpush3.bf16.msra.mxu0 %v1442_v16 }
 0x1dd   : > { %1368 = vmatprep.subr.bf16.mxu0 %v1443_v41 }
 0x1e0   : > { %1369 = vmatpush3.bf16.msra.mxu0 %v1443_v41 }
 0x1e1   : > { %1370 = vmatprep.subr.bf16.mxu0 %v1444_v63 }
 0x1e4   : > { %1371 = vmatpush3.bf16.msra.mxu0 %v1444_v63 }
 0x2a2   : > { %v1338_v18 = vpop.f32.mrb[8].mxu0 }
 0x2a3   : > { %v575_v19 = vadd.f32 %v1338_v18, %v1178_v17  ;;  %v566_v21 = vpop.f32.mrb[9].mxu0 }
 0x2a4   : > { %v567_v22 = vadd.f32 %v1178_v17, %v566_v21  ;;  %v1339_v24 = vpop.f32.mrb[10].mxu0 }
 0x2a5   : > { %v607_v25 = vadd.f32 %v599_v20, %v575_v19  ;;  %v578_v28 = vadd.f32 %v1339_v24, %v1178_v17  ;;  %v569_v30 = vpop.f32.mrb[11].mxu0 }
 0x2a6   : > { %v605_v31 = vadd.f32 %v597_v23, %v567_v22  ;;  %v570_v32 = vadd.f32 %v1178_v17, %v569_v30 }
 0x2a7   : > { %v608_v34 = vadd.f32 %v600_v29, %v578_v28  ;;  %v615_v36 = vmax.f32 %v607_v25, 0.0 }
 0x2a8   : > { %v606_v35 = vadd.f32 %v598_v33, %v570_v32  ;;  %v613_v38 = vmax.f32 %v605_v31, 0.0  ;;  %v1446_v32 = vld [vmem:[%s1684_s1 + $0x148] sm:$0xff]   ;;  %v1447_v33 = vld [vmem:[%s1684_s1 + $0x150] sm:$0xff]  }
 0x2a9   : > { %v616_v37 = vmax.f32 %v608_v34, 0.0  ;;  %v1448_v34 = vld [vmem:[%s1684_s1 + $0x158] sm:$0xff]  }
 0x2aa   : > { %v614_v39 = vmax.f32 %v606_v35, 0.0  ;;  %v1342_v42 = vpop.f32.mrb[12].mxu0  ;;  %v1218_v35 = vld [vmem:[%s1685_s2 + $0x4] ss:$0 sm:$0xff] }
 0x2ab   : > { %v1607_v43 = vpack.c.bf16 %v616_v37, %v615_v36  ;;  %v591_v44 = vadd.f32 %v1342_v42, %v1178_v17  ;;  %v582_v46 = vpop.f32.mrb[13].mxu0 }
 0x2ac   : > { %v1610_v47 = vpack.c.bf16 %v614_v39, %v613_v38  ;;  %v583_v26 = vadd.f32 %v1178_v17, %v582_v46  ;;  %v1343_v49 = vpop.f32.mrb[14].mxu0 }
 0x2ad   : > { %v611_v27 = vadd.f32 %v603_v45, %v591_v44  ;;  %v594_v50 = vadd.f32 %v1343_v49, %v1178_v17  ;;  %v585_v52 = vpop.f32.mrb[15].mxu0  ;;  %v885_v38 = vunpack.c.l.bf16 %v1607_v43 }
 0x2ae   : > { %v609_v53 = vadd.f32 %v601_v48, %v583_v26  ;;  %v586_v54 = vadd.f32 %v1178_v17, %v585_v52  ;;  %1352 = vmatprep.mubr.msk.bf16.mxu1 %vm375_vm1, %v1610_v47  ;;  %v883_v44 = vunpack.c.l.bf16 %v1610_v47  ;;  %v886_v48 = vunpack.c.h.bf16 %v1607_v43 }
 0x2af   : > { %v612_v56 = vadd.f32 %v604_v51, %v594_v50  ;;  %1353 = vmatmul.mubr.msk.bf16.vlgmr.msra.gmra.mrb[8].mxu1 %vm375_vm1, %v1607_v43  ;;  %v619_v58 = vmax.f32 %v611_v27, 0.0  ;;  %v884_v51 = vunpack.c.h.bf16 %v1610_v47 }
 0x2b0   : > { %v610_v57 = vadd.f32 %v602_v55, %v586_v54  ;;  %v617_v60 = vmax.f32 %v609_v53, 0.0  ;;  %1381 = vmatpush3.bf16.msra.mxu1 %v1445_v0 }
 0x2b1   : > { %v620_v59 = vmax.f32 %v612_v56, 0.0  ;;  %1382 = vmatprep.subr.bf16.mxu1 %v1446_v32 }
 0x2b2   : > { %v618_v61 = vmax.f32 %v610_v57, 0.0 }
 0x2b3   : > { %v1619_v62 = vpack.c.bf16 %v620_v59, %v619_v58 }
 0x2b4   : > { %v1621_v40 = vpack.c.bf16 %v618_v61, %v617_v60  ;;  %1383 = vmatpush3.bf16.msra.mxu1 %v1446_v32 }
 0x2b5   : > { %1384 = vmatprep.subr.bf16.mxu1 %v1447_v33  ;;  %v889_v61 = vunpack.c.l.bf16 %v1619_v62  ;;  %v890_v47 = vunpack.c.h.bf16 %v1619_v62 }
 0x2b6   : > { %1356 = vmatprep.mubr.msk.bf16.mxu1 %vm375_vm1, %v1621_v40  ;;  %v887_v43 = vunpack.c.l.bf16 %v1621_v40 }
 0x2b7   : > { %1357 = vmatmul.mubr.msk.bf16.gmra.mrb[12].mxu1 %vm375_vm1, %v1619_v62  ;;  %v1237_v62 = vld [vmem:[%s1685_s2 + $0x5] ss:$0 sm:$0xff] }
 0x2b8   : > { %1385 = vmatpush3.bf16.msra.mxu1 %v1447_v33 }
 0x2b9   : > { %1386 = vmatprep.subr.bf16.mxu1 %v1448_v34 }
 0x2bc   : > { %1387 = vmatpush3.bf16.msra.mxu1 %v1448_v34 }
 0x382   : > { %v1354_v2 = vpop.f32.mrb[8].mxu1 }
 0x383   : > { %v718_v3 = vadd.f32 %v1354_v2, %v1197_v1  ;;  %v709_v4 = vpop.f32.mrb[9].mxu1 }
 0x384   : > { %v710_v5 = vadd.f32 %v1197_v1, %v709_v4  ;;  %v1355_v6 = vpop.f32.mrb[10].mxu1 }
 0x385   : > { %v721_v7 = vadd.f32 %v1355_v6, %v1197_v1  ;;  %v712_v8 = vpop.f32.mrb[11].mxu1  ;;  %v742_v10 = vmax.f32 %v718_v3, 0.0 }
 0x386   : > { %v713_v9 = vadd.f32 %v1197_v1, %v712_v8  ;;  %v740_v12 = vmax.f32 %v710_v5, 0.0 }
 0x387   : > { %v743_v11 = vmax.f32 %v721_v7, 0.0  ;;  %v888_v7 = vunpack.c.h.bf16 %v1621_v40 }
 0x388   : > { %v741_v13 = vmax.f32 %v713_v9, 0.0 }
 0x389   : > { %v749_v14 = vpack.c.bf16 %v743_v11, %v742_v10 }
 0x38a   : > { %v748_v15 = vpack.c.bf16 %v741_v13, %v740_v12  ;;  %v1358_v16 = vpop.f32.mrb[12].mxu1 }
 0x38b   : > { %v734_v17 = vadd.f32 %v1358_v16, %v1197_v1  ;;  %v725_v18 = vpop.f32.mrb[13].mxu1 }
 0x38c   : > { %v726_v19 = vadd.f32 %v1197_v1, %v725_v18  ;;  %v1359_v20 = vpop.f32.mrb[14].mxu1  ;;  %1372 = vmatprep.mubr.msk.bf16.mxu0 %vm519_vm2, %v748_v15 }
 0x38d   : > { %v737_v21 = vadd.f32 %v1359_v20, %v1197_v1  ;;  %v728_v22 = vpop.f32.mrb[15].mxu1  ;;  %1373 = vmatmul.mubr.msk.bf16.vlgmr.msra.gmra.mrb[16].mxu0 %vm519_vm2, %v749_v14  ;;  %v746_v24 = vmax.f32 %v734_v17, 0.0 }
 0x38e   : > { %v729_v23 = vadd.f32 %v1197_v1, %v728_v22  ;;  %v744_v28 = vmax.f32 %v726_v19, 0.0 }
 0x38f   : > { %v747_v25 = vmax.f32 %v737_v21, 0.0 }
 0x390   : > { %v745_v29 = vmax.f32 %v729_v23, 0.0 }
 0x391   : > { %v751_v30 = vpack.c.bf16 %v747_v25, %v746_v24 }
 0x392   : > { %v750_v31 = vpack.c.bf16 %v745_v29, %v744_v28 }
 0x394   : > { %1376 = vmatprep.mubr.msk.bf16.mxu0 %vm519_vm2, %v750_v31 }
 0x395   : > { %1377 = vmatmul.mubr.msk.bf16.gmra.mrb[20].mxu0 %vm519_vm2, %v751_v30 }
 0x460   : > { %v1374_v36 = vpop.f32.mrb[16].mxu0 }
 0x461   : > { %v861_v37 = vadd.f32 %v1374_v36, %v1218_v35  ;;  %v852_v39 = vpop.f32.mrb[17].mxu0 }
 0x462   : > { %v853_v42 = vadd.f32 %v1218_v35, %v852_v39  ;;  %v1375_v45 = vpop.f32.mrb[18].mxu0 }
 0x463   : > { %v893_v46 = vadd.f32 %v885_v38, %v861_v37  ;;  %v864_v26 = vadd.f32 %v1375_v45, %v1218_v35  ;;  %v855_v49 = vpop.f32.mrb[19].mxu0 }
 0x464   : > { %v891_v27 = vadd.f32 %v883_v44, %v853_v42  ;;  %v856_v50 = vadd.f32 %v1218_v35, %v855_v49 }
 0x465   : > { %v894_v52 = vadd.f32 %v886_v48, %v864_v26  ;;  %v901_v54 = vmax.f32 %v893_v46, 0.0 }
 0x466   : > { %v892_v53 = vadd.f32 %v884_v51, %v856_v50  ;;  %v899_v56 = vmax.f32 %v891_v27, 0.0  ;;  %v1047_v51 = vlaneseq }
 0x467   : > { %v902_v55 = vmax.f32 %v894_v52, 0.0 }
 0x468   : > { %v900_v57 = vmax.f32 %v892_v53, 0.0  ;;  %v1378_v58 = vpop.f32.mrb[20].mxu0 }
 0x469   : > { %v908_v59 = vpack.c.bf16 %v902_v55, %v901_v54  ;;  %v877_v60 = vadd.f32 %v1378_v58, %v1218_v35  ;;  %v868_v41 = vpop.f32.mrb[21].mxu0  ;;  %v1048_v54 = vshrl.u32 %v1047_v51, 7 }
 0x46a   : > { %v907_v63 = vpack.c.bf16 %v900_v57, %v899_v56  ;;  %v869_v0 = vadd.f32 %v1218_v35, %v868_v41  ;;  %v1379_v1 = vpop.f32.mrb[22].mxu0 }
 0x46b   : > { %v897_v2 = vadd.f32 %v889_v61, %v877_v60  ;;  %v880_v3 = vadd.f32 %v1379_v1, %v1218_v35  ;;  %v871_v4 = vpop.f32.mrb[23].mxu0  ;;  %vm1049_vm3 = vcmp.eq.s32.totalorder %v1048_v54, 0 }
 0x46c   : > { %v895_v5 = vadd.f32 %v887_v43, %v869_v0  ;;  %v872_v6 = vadd.f32 %v1218_v35, %v871_v4  ;;  %1388 = vmatprep.mubr.msk.bf16.mxu1 %vm375_vm1, %v907_v63 }
 0x46d   : > { %v898_v8 = vadd.f32 %v890_v47, %v880_v3  ;;  %1389 = vmatmul.mubr.msk.bf16.vlgmr.msra.gmra.mrb[16].mxu1 %vm375_vm1, %v908_v59  ;;  %v905_v10 = vmax.f32 %v897_v2, 0.0 }
 0x46e   : > { %v896_v9 = vadd.f32 %v888_v7, %v872_v6  ;;  %v903_v12 = vmax.f32 %v895_v5, 0.0 }
 0x46f   : > { %v906_v11 = vmax.f32 %v898_v8, 0.0 }
 0x470   : > { %v904_v13 = vmax.f32 %v896_v9, 0.0 }
 0x471   : > { %v910_v14 = vpack.c.bf16 %v906_v11, %v905_v10 }
 0x472   : > { %v909_v15 = vpack.c.bf16 %v904_v13, %v903_v12 }
 0x474   : > { %1392 = vmatprep.mubr.msk.bf16.mxu1 %vm375_vm1, %v909_v15 }
 0x475   : > { %1393 = vmatmul.mubr.msk.bf16.gmra.mrb[20].mxu1 %vm375_vm1, %v910_v14 }
 0x540   : > { %v1390_v40 = vpop.f32.mrb[16].mxu1 }
 0x541   : > { %v995_v16 = vpop.f32.mrb[17].mxu1  ;;  %v1004_v20 = vadd.f32 %v1390_v40, %v1237_v62 }
 0x542   : > { %v996_v17 = vadd.f32 %v1237_v62, %v995_v16  ;;  %v1391_v18 = vpop.f32.mrb[18].mxu1 }
 0x543   : > { %v998_v19 = vpop.f32.mrb[19].mxu1  ;;  %v1007_v23 = vadd.f32 %v1391_v18, %v1237_v62  ;;  %v1028_v25 = vmax.f32 %v1004_v20, 0.0 }
 0x544   : > { %v999_v21 = vadd.f32 %v1237_v62, %v998_v19  ;;  %v1026_v22 = vmax.f32 %v996_v17, 0.0 }
 0x545   : > { %v1029_v31 = vmax.f32 %v1007_v23, 0.0 }
 0x546   : > { %v1027_v24 = vmax.f32 %v999_v21, 0.0 }
 0x548   : > { %v1034_v28 = vadd.f32 %v1027_v24, %v1026_v22  ;;  %v1394_v29 = vpop.f32.mrb[20].mxu1 }
 0x549   : > { %v1011_v30 = vpop.f32.mrb[21].mxu1  ;;  %v1020_v36 = vadd.f32 %v1394_v29, %v1237_v62 }
 0x54a   : > { %v1035_v32 = vadd.f32 %v1034_v28, %v1028_v25  ;;  %v1012_v33 = vadd.f32 %v1237_v62, %v1011_v30  ;;  %v1395_v34 = vpop.f32.mrb[22].mxu1 }
 0x54b   : > { %v1014_v35 = vpop.f32.mrb[23].mxu1  ;;  %v1023_v44 = vadd.f32 %v1395_v34, %v1237_v62  ;;  %v1032_v46 = vmax.f32 %v1020_v36, 0.0 }
 0x54c   : > { %v1030_v37 = vmax.f32 %v1012_v33, 0.0  ;;  %v1036_v38 = vadd.f32 %v1035_v32, %v1029_v31  ;;  %v1015_v39 = vadd.f32 %v1237_v62, %v1014_v35 }
 0x54d   : > { %v1033_v48 = vmax.f32 %v1023_v44, 0.0 }
 0x54e   : > { %v1037_v42 = vadd.f32 %v1036_v38, %v1030_v37  ;;  %v1031_v45 = vmax.f32 %v1015_v39, 0.0 }
 0x550   : > { %v1038_v26 = vadd.f32 %v1037_v42, %v1031_v45 }
 0x552   : > { %v1039_v49 = vadd.f32 %v1038_v26, %v1032_v46 }
 0x554   : > { %v1040_v27 = vadd.f32 %v1039_v49, %v1033_v48 }
 0x556   : > { %v1041_v50 = vrot.slane %v1040_v27, 4 }
 0x558   : > { %v1042_v52 = vadd.f32 %v1041_v50, %v1040_v27 }
 0x55a   : > { %v1043_v53 = vrot.slane %v1042_v52, 2 }
 0x55c   : > { %v1044_v55 = vadd.f32 %v1043_v53, %v1042_v52 }
 0x55e   : > { %v1045_v56 = vrot.slane %v1044_v55, 1 }
 0x560   : > { %v1046_v57 = vadd.f32 %v1045_v56, %v1044_v55 }
 0x562   : > { %v1052_v58 = vsel %vm1049_vm3, %v1046_v57, 0.0 }
 0x563   : > { %1053 = vst [vmem:[%s204_s16] sm:$0xff] %v1052_v58 }
 0x564 PF: > { %s13_s14 = sadd.s32 1, %s1471_s14   ;;  %s1687_s12 = smov %s1467_s13 }
 0x565   : > { %p10_p5 = scmp.ge.s32.totalorder %s13_s14, 4   ;;  %s1688_s13 = smov %s1690_s15 }
 0x567   :  { %12 = sbr.rel (!%p10_p5) target bundleno = 2 (0x2), region = 67 }

</bundles_post_ra>
